<compile_context>
chip_gen: v6e
topology: v6e:2x2x1
jax: 0.10.0
libtpu: 0.0.40
codegen_flags: <defaults>
</compile_context>

<pallas_src>
import jax
import jax.numpy as jnp
from jax.experimental import pallas as pl
from jax.experimental.pallas import tpu as pltpu


def _round_up(x, m):
    return (x + m - 1) // m * m


def _cdiv(a, b):
    return -(-a // b)


def _plan_tiles(M, max_lane_tile):
    """Choose (lane_tile, num_steps, M_pad) with bounded padding waste.

    Large M gets >= 2 (even) grid steps so the 'parallel' grid axis actually
    shards across both TensorCores on v7x; v5e/v6e just see one extra cheap step.
    """
    M128 = _round_up(max(int(M), 1), 128)
    max_tile = _round_up(max(128, min(int(max_lane_tile), M128)), 128)
    num_steps = _cdiv(M128, max_tile)
    if M128 > 2048:
        num_steps = max(num_steps, 2)
        if num_steps % 2:            # even step count -> balanced v7x core split
            num_steps += 1
    lane_tile = _round_up(_cdiv(M128, num_steps), 128)
    M_pad = num_steps * lane_tile
    return lane_tile, num_steps, M_pad


def pack_inputs(X, Q, M_pad=None):
    """Build the feature-major input stream [X^T ; Q^T] -> (n_vars + n_q, M_pad).

    This is the layout the kernel wants (rows on the 128-wide lane axis, features
    on sublanes).  For best performance, produce/persist this buffer upstream,
    fused with whatever creates X/Q — calling it right before the kernel costs
    one extra HBM pass over the inputs.
    """
    N, A, n_vars = X.shape
    _, _, n_q = Q.shape
    M = N * A
    xq = jnp.concatenate(
        [X.reshape(M, n_vars).T, Q.reshape(M, n_q).T], axis=0
    ).astype(jnp.float32)
    if M_pad is not None and M_pad != M:
        xq = jnp.pad(xq, ((0, 0), (0, M_pad - M)))
    return xq


def hybrid_kernel(xq_ref, w_in_ref, b1_ref, w2t_ref, b2_ref, out_ref):
    # Single fused MXU push: (8+H, F) @ (F, T) -> (8+H, T)
    #   row 0          : U_MNL            (theta^T @ X^T)
    #   rows 8 .. 8+H-1: hidden pre-acts  (W1^T @ Q^T)   (8-offset keeps both
    #                                                     slices sublane-aligned)
    z = jnp.dot(w_in_ref[...], xq_ref[...], preferred_element_type=jnp.float32)

    u_mnl = z[0:1, :]                                      # (1, T)  lane-dense
    h = jnp.maximum(z[8:, :] + b1_ref[...], 0.0)           # (H, T)
    r = jnp.dot(w2t_ref[...], h,
                preferred_element_type=jnp.float32) + b2_ref[...]   # (1, T)

    # Merged output block: row 0 = U_total, row 1 = U_MNL, row 2 = r.
    out_ref[0:1, :] = u_mnl + r
    out_ref[1:2, :] = u_mnl
    out_ref[2:3, :] = r


def hybrid_forward_packed(xq, theta, w1, b1, w2, b2, *, N, A,
                          max_lane_tile=32768):
    """Run the Pallas kernel on a pre-packed feature-major stream.

    xq: (n_vars + n_q, M_pad) float32, produced by pack_inputs (M = N*A).
    Parameter convention: w1: (n_q, H), b1: (1, H) or (H,), w2: (H, 1) or (H,),
    b2: (1, 1) or scalar — i.e. PyTorch nn.Linear weights pre-transposed to
    (in, out).  Returns (U_total, U_MNL, r), each (N, A) float32.
    """
    M = N * A
    n_vars = int(theta.shape[0])
    F = int(xq.shape[0])
    n_q = F - n_vars
    H = int(w1.shape[1])
    # Guard the weight convention (raw PyTorch nn.Linear weights are (out, in)).
    assert w1.shape == (n_q, H), (
        f"w1 must be (n_q, H)=({n_q},{H}) [transpose PyTorch nn.Linear.weight], got {w1.shape}")
    assert int(jnp.size(w2)) == H, f"w2 must have H={H} elements, got shape {w2.shape}"
    assert int(jnp.size(b1)) == H and int(jnp.size(b2)) == 1

    lane_tile, num_steps, M_pad = _plan_tiles(M, max_lane_tile)
    if xq.shape[1] != M_pad:
        if xq.shape[1] < M_pad:
            xq = jnp.pad(xq, ((0, 0), (0, M_pad - xq.shape[1])))
        else:
            xq = xq[:, :M_pad]

    # Block-diagonal fused weight: row 0 = theta^T (MNL), rows 8..8+H-1 = W1^T.
    R = 8 + H
    w_in = jnp.zeros((R, F), jnp.float32)
    w_in = w_in.at[0, :n_vars].set(jnp.asarray(theta, jnp.float32).reshape(-1))
    w_in = w_in.at[8:, n_vars:].set(jnp.asarray(w1, jnp.float32).T)
    b1c = jnp.asarray(b1, jnp.float32).reshape(H, 1)       # column bias
    w2t = jnp.asarray(w2, jnp.float32).reshape(H, 1).T     # (1, H)
    b2c = jnp.asarray(b2, jnp.float32).reshape(1, 1)

    grid = (M_pad // lane_tile,)
    stream_spec = pl.BlockSpec((F, lane_tile), lambda i: (0, i))
    out_spec = pl.BlockSpec((3, lane_tile), lambda i: (0, i))
    full = lambda rows, cols: pl.BlockSpec((rows, cols), lambda i: (0, 0))

    out = pl.pallas_call(
        hybrid_kernel,
        out_shape=jax.ShapeDtypeStruct((3, M_pad), jnp.float32),
        grid_spec=pltpu.PrefetchScalarGridSpec(
            num_scalar_prefetch=0,
            grid=grid,
            in_specs=[
                stream_spec,      # fused [X;Q]^T tile (lane-dense)
                full(R, F),       # fused block-diagonal [theta^T (+) W1^T]
                full(H, 1),       # b1 as a column
                full(1, H),       # W2^T
                full(1, 1),       # b2
            ],
            out_specs=out_spec,   # single merged (3, lane_tile) block
        ),
        compiler_params=pltpu.CompilerParams(
            dimension_semantics=("parallel",),
            vmem_limit_bytes=48 * 1024 * 1024,
        ),
    )(xq, w_in, b1c, w2t, b2c)

    crop = lambda row: out[row, :M].reshape(N, A)
    return crop(0), crop(1), crop(2)


def hybrid_forward(X, Q, theta, w1, b1, w2, b2, *, max_lane_tile=32768):
    """Convenience wrapper: packs X/Q feature-major and runs the kernel.

    For production use, produce the packed stream upstream (pack_inputs fused
    with data creation) and call hybrid_forward_packed directly — the packing
    here costs an extra HBM pass over the inputs.
    """
    N, A, _ = X.shape
    M = N * A
    _, _, M_pad = _plan_tiles(M, max_lane_tile)
    xq = pack_inputs(X, Q, M_pad)
    return hybrid_forward_packed(xq, theta, w1, b1, w2, b2, N=N, A=A,
                                 max_lane_tile=max_lane_tile)


if __name__ == "__main__":
    # Small shapes consistent with the module:
    #   num_sessions N = 8, no_alts A = 3, n_vars = 4, n_q = 5, hidden_size = 10
    N, A, n_vars, n_q, hidden = 8, 3, 4, 5, 10

    key = jax.random.PRNGKey(0)
    kx, kq, kt, kw1, kb1, kw2, kb2 = jax.random.split(key, 7)

    X = jax.random.normal(kx, (N, A, n_vars), dtype=jnp.float32)
    Q = jax.random.normal(kq, (N, A, n_q), dtype=jnp.float32)

    # Deterministic synthetic parameters (module init gives the shapes);
    # weights already in (in, out) convention.
    theta = jax.random.normal(kt, (n_vars, 1), dtype=jnp.float32) * 0.1
    w1 = jax.random.normal(kw1, (n_q, hidden), dtype=jnp.float32) * 0.1
    b1 = jax.random.normal(kb1, (1, hidden), dtype=jnp.float32) * 0.1
    w2 = jax.random.normal(kw2, (hidden, 1), dtype=jnp.float32) * 0.1
    b2 = jax.random.normal(kb2, (1, 1), dtype=jnp.float32) * 0.1

    u_total, u_mnl, r = hybrid_forward(X, Q, theta, w1, b1, w2, b2)
    jax.block_until_ready((u_total, u_mnl, r))

    # Pure-JAX reference check (eval-mode dropout = identity).
    u_mnl_ref = jnp.squeeze(jnp.matmul(X, theta), axis=2)
    h_ref = jnp.maximum(Q.reshape(-1, n_q) @ w1 + b1, 0.0)
    r_ref = (h_ref @ w2 + b2).reshape(N, A)
    assert jnp.allclose(u_mnl, u_mnl_ref, atol=1e-5)
    assert jnp.allclose(r, r_ref, atol=1e-5)
    assert jnp.allclose(u_total, u_mnl_ref + r_ref, atol=1e-5)

    print("KERNEL_OK")
</pallas_src>

<mosaic_0001>
module attributes {stable_mosaic.version = 11 : i64} {
  func.func @hybrid_kernel(%arg0: i32, %arg1: memref<9x128xf32, #tpu.memory_space<vmem>>, %arg2: memref<18x9xf32, #tpu.memory_space<vmem>>, %arg3: memref<10x1xf32, #tpu.memory_space<vmem>>, %arg4: memref<1x10xf32, #tpu.memory_space<vmem>>, %arg5: memref<1x1xf32, #tpu.memory_space<vmem>>, %arg6: memref<3x128xf32, #tpu.memory_space<vmem>>) attributes {dimension_semantics = [#tpu.dimension_semantics<parallel>], iteration_bounds = array<i64: 1>, scalar_prefetch = 0 : i64, scratch_operands = 0 : i64, tpu.core_type = #tpu.core_type<tc>, window_params = [{transform_indices = @transform_0, window_bounds = array<i64: 9, 128>}, {pipeline_mode = #tpu.pipeline_mode<synchronous>, transform_indices = @transform_1, window_bounds = array<i64: 18, 9>}, {pipeline_mode = #tpu.pipeline_mode<synchronous>, transform_indices = @transform_2, window_bounds = array<i64: 10, 1>}, {pipeline_mode = #tpu.pipeline_mode<synchronous>, transform_indices = @transform_3, window_bounds = array<i64: 1, 10>}, {pipeline_mode = #tpu.pipeline_mode<synchronous>, transform_indices = @transform_4, window_bounds = array<i64: 1, 1>}, {transform_indices = @transform_5, window_bounds = array<i64: 3, 128>}]} {
    %c0 = arith.constant 0 : index
    %c0_0 = arith.constant 0 : index
    %0 = vector.load %arg2[%c0, %c0_0] : memref<18x9xf32, #tpu.memory_space<vmem>>, vector<18x9xf32>
    %c0_1 = arith.constant 0 : index
    %c0_2 = arith.constant 0 : index
    %1 = vector.load %arg1[%c0_1, %c0_2] : memref<9x128xf32, #tpu.memory_space<vmem>>, vector<9x128xf32>
    %cst = arith.constant dense<0.000000e+00> : vector<18x128xf32>
    %2 = tpu.matmul %0, %1, %cst {dimension_numbers = #tpu.dot_dimension_numbers<[1], [0], [0], [1], [0, 0, 1, 1], [], []>} : vector<18x9xf32>, vector<9x128xf32>, vector<18x128xf32> -> vector<18x128xf32>
    %3 = vector.extract_strided_slice %2 {offsets = [0, 0], sizes = [1, 128], strides = [1, 1]} : vector<18x128xf32> to vector<1x128xf32>
    %4 = vector.extract_strided_slice %2 {offsets = [8, 0], sizes = [10, 128], strides = [1, 1]} : vector<18x128xf32> to vector<10x128xf32>
    %c0_3 = arith.constant 0 : index
    %c0_4 = arith.constant 0 : index
    %5 = vector.load %arg3[%c0_3, %c0_4] : memref<10x1xf32, #tpu.memory_space<vmem>>, vector<10x1xf32>
    %6 = vector.broadcast %5 : vector<10x1xf32> to vector<10x128xf32>
    %7 = arith.addf %4, %6 : vector<10x128xf32>
    %cst_5 = arith.constant 0.000000e+00 : f32
    %8 = vector.broadcast %cst_5 : f32 to vector<10x128xf32>
    %9 = arith.maximumf %7, %8 : vector<10x128xf32>
    %c0_6 = arith.constant 0 : index
    %c0_7 = arith.constant 0 : index
    %10 = vector.load %arg4[%c0_6, %c0_7] : memref<1x10xf32, #tpu.memory_space<vmem>>, vector<1x10xf32>
    %cst_8 = arith.constant dense<0.000000e+00> : vector<1x128xf32>
    %11 = tpu.matmul %10, %9, %cst_8 {dimension_numbers = #tpu.dot_dimension_numbers<[1], [0], [0], [1], [0, 0, 1, 1], [], []>} : vector<1x10xf32>, vector<10x128xf32>, vector<1x128xf32> -> vector<1x128xf32>
    %c0_9 = arith.constant 0 : index
    %c0_10 = arith.constant 0 : index
    %12 = vector.load %arg5[%c0_9, %c0_10] : memref<1x1xf32, #tpu.memory_space<vmem>>, vector<1x1xf32>
    %13 = vector.broadcast %12 : vector<1x1xf32> to vector<1x128xf32>
    %14 = arith.addf %11, %13 : vector<1x128xf32>
    %15 = arith.addf %3, %14 : vector<1x128xf32>
    %c0_11 = arith.constant 0 : index
    %c0_12 = arith.constant 0 : index
    %16 = vector.load %arg6[%c0_11, %c0_12] : memref<3x128xf32, #tpu.memory_space<vmem>>, vector<1x128xf32>
    tpu.vector_store %arg6[%c0_11, %c0_12], %15 {strides = array<i32>} : memref<3x128xf32, #tpu.memory_space<vmem>>, vector<1x128xf32>,
    %c1 = arith.constant 1 : index
    %c0_13 = arith.constant 0 : index
    %17 = vector.load %arg6[%c1, %c0_13] : memref<3x128xf32, #tpu.memory_space<vmem>>, vector<1x128xf32>
    tpu.vector_store %arg6[%c1, %c0_13], %3 {strides = array<i32>} : memref<3x128xf32, #tpu.memory_space<vmem>>, vector<1x128xf32>,
    %c2 = arith.constant 2 : index
    %c0_14 = arith.constant 0 : index
    %18 = vector.load %arg6[%c2, %c0_14] : memref<3x128xf32, #tpu.memory_space<vmem>>, vector<1x128xf32>
    tpu.vector_store %arg6[%c2, %c0_14], %14 {strides = array<i32>} : memref<3x128xf32, #tpu.memory_space<vmem>>, vector<1x128xf32>,
    return
  }
  func.func @transform_0(%arg0: i32) -> (i32, i32) {
    %c0_i32 = arith.constant 0 : i32
    %c0_i32_0 = arith.constant 0 : i32
    return %c0_i32, %arg0 : i32, i32
  }
  func.func @transform_1(%arg0: i32) -> (i32, i32) {
    %c0_i32 = arith.constant 0 : i32
    %c0_i32_0 = arith.constant 0 : i32
    %c0_i32_1 = arith.constant 0 : i32
    return %c0_i32, %c0_i32_0 : i32, i32
  }
  func.func @transform_2(%arg0: i32) -> (i32, i32) {
    %c0_i32 = arith.constant 0 : i32
    %c0_i32_0 = arith.constant 0 : i32
    %c0_i32_1 = arith.constant 0 : i32
    return %c0_i32, %c0_i32_0 : i32, i32
  }
  func.func @transform_3(%arg0: i32) -> (i32, i32) {
    %c0_i32 = arith.constant 0 : i32
    %c0_i32_0 = arith.constant 0 : i32
    %c0_i32_1 = arith.constant 0 : i32
    return %c0_i32, %c0_i32_0 : i32, i32
  }
  func.func @transform_4(%arg0: i32) -> (i32, i32) {
    %c0_i32 = arith.constant 0 : i32
    %c0_i32_0 = arith.constant 0 : i32
    %c0_i32_1 = arith.constant 0 : i32
    return %c0_i32, %c0_i32_0 : i32, i32
  }
  func.func @transform_5(%arg0: i32) -> (i32, i32) {
    %c0_i32 = arith.constant 0 : i32
    %c0_i32_0 = arith.constant 0 : i32
    return %c0_i32, %arg0 : i32, i32
  }
}

</mosaic_0001>

<bundles_post_ra>
// kernel: tpu_custom_call.1
= control target key start
LH: loop header
LB: loop body
LE: loop exit
PB: predicated region body
PF: predicated region fallthrough
CT: control target
= control target key end

     0   :  { %s378_s0 = inlined_call_operand.vmem [shape: f32[9,128], index: 0, kind: input, shape index: {}]   ;;  %s379_s1 = inlined_call_operand.vmem [shape: f32[18,9], index: 1, kind: input, shape index: {}]   ;;  %s380_s2 = inlined_call_operand.vmem [shape: f32[10,1], index: 2, kind: input, shape index: {}]   ;;  %s381_s3 = inlined_call_operand.vmem [shape: f32[1,10], index: 3, kind: input, shape index: {}]   ;;  %s382_s4 = inlined_call_operand.<no memory space> [shape: f32[1,1], index: 4, kind: input, shape index: {}]   ;;  %s383_s5 = inlined_call_operand.hbm [shape: f32[3,128], index: 5, kind: output, shape index: {}]  }
   0x1   :  { %v10_v0 = vstv %s382_s4 }
   0x2   :  { %11 = vst [vmem:[#allocation2] sm:$0x1] %v10_v0 }
   0x3   :  { %v27_v1 = vld [vmem:[%s378_s0 + $0x8] sm:$0x1]  ;;  %vm38_vm0 = vcmask 1040384   ;;  %v311_v2 = vmov 0.0   ;;  %v26_v3 = vld [vmem:[%s378_s0] sm:$0xff] }
   0x4   :  { %259 = vmatprep.subr.mxu0 %v311_v2  ;;  %279 = vmatprep.subr.mxu1 %v311_v2 }
   0x5   :  { %260 = vmatpush3.msk.msra.mxu0 %vm38_vm0, %v27_v1  ;;  %281 = vmatpush3.msk.msra.mxu1 %vm38_vm0, %v27_v1 }
   0x6   :  { %12 = vsyncpa [#allocation4], 0  ;;  %261 = vmatprep.subr.mxu0 %v311_v2  ;;  %280 = vmatprep.subr.mxu1 %v311_v2  ;;  %v23_v4 = vld [vmem:[%s379_s1] sm:$0xff]  ;;  %vm28_vm1 = vcmask 72704   ;;  %v25_v5 = vld [vmem:[%s379_s1 + $0x10] sm:$0x3]  ;;  %v145_v24 = vlaneseq }
   0x7   :  { %262 = vmatpush3.msra.mxu0 %v26_v3  ;;  %282 = vmatpush3.msra.mxu1 %v26_v3  ;;  %vm312_vm2 = vmmov 0   ;;  %v123_v6 = vld [vmem:[%s380_s2 + $0x8] sm:$0x3]  ;;  %v313_v8 = vmov 0   ;;  %v122_v9 = vld [vmem:[%s380_s2] sm:$0xff]  ;;  %vm153_vm3 = vcmask 1041408  }
   0x8   :  { %263 = vmatprep.mubr.msk.f32.mxu0 %vm312_vm2, %v311_v2  ;;  %269 = vmatprep.mubr.msk.f32.mxu1 %vm312_vm2, %v311_v2  ;;  %v24_v7 = vld [vmem:[%s379_s1 + $0x8] sm:$0xff]  ;;  %v138_v23 = vld [vmem:[%s381_s3] sm:$0x1]  ;;  %vm149_vm4 = vcmask 80896   ;;  %v146_v25 = vshrl.u32 %v145_v24, 7  ;;  %s314_s7 = smov [#allocation3]  }
   0x9   :  { %264 = vmatmul.mubr.msk.f32.vlgmr.msra.gmra.mxu0 %vm28_vm1, %v23_v4  ;;  %270 = vmatmul.mubr.msk.f32.vlgmr.msra.gmra.mxu1 %vm28_vm1, %v25_v5  ;;  %v139_v10 = vld [vmem:[#allocation2] sm:$0x1]  ;;  %s237_s8 = sshll.u32 %s314_s7, 4  ;;  %s238_s8 = int_to_ptr.vmem [resolvable:$true] %s237_s8 }
   0xa   :  { %266 = vmatprep.mubr.msk.f32.mxu0 %vm312_vm2, %v311_v2  ;;  %287 = vset.pattern.permute.xlu0 %v313_v8  ;;  %v147_v26 = vsub.s32 0, %v146_v25  ;;  %s289_s9 = scalar_lea.vmem %s238_s8, 64  ;;  %p294_p1 = scmp.lt.s32.totalorder %s238_s8, %s238_s8 }
   0xb   :  { %131 = vperm.xlu0 %287, %v123_v6   ;;  %272 = vmatprep.subr.mxu1 %v311_v2  ;;  %p290_p0 = scmp.ne.s32.totalorder %s238_s8, %s289_s9  ;;  %p295_p2 = scmp.lt.s32.totalorder %s289_s9, %s289_s9 }
   0xc   :  { %276 = vmatprep.mubr.msk.f32.mxu1 %vm312_vm2, %v311_v2  ;;  %288 = vset.pattern.permute.xlu1 %v313_v8 }
   0xd   :  { %267 = vmatmul.mubr.msk.f32.gmra.mxu0 %vm28_vm1, %v24_v7  ;;  %142 = vperm.xlu1 %288, %v139_v10   ;;  %p296_p3 = por %p295_p2, %p294_p1 }
   0xf   :  { %126 = vperm.xlu0 %287, %v122_v9   ;;  %p297_p4 = pnand %p296_p3, %p290_p0 }
  0x86   :  { %v132_v11 = vpop.permute.xlu0 %131 }
  0x88   :  { %v143_v27 = vpop.permute.xlu1 %142 }
  0x89   :  { %v148_v28 = vrot.slane %v143_v27, %v147_v26 }
  0x8a   :  { %v127_v18 = vpop.permute.xlu0 %126 }
  0xc9   :  { %v108_v12 = vpop.f32.mrf.mxu0  ;;  %v118_v13 = vpop.f32.mrf.mxu1 }
  0xca   :  { %229 = vst [vmem:[#allocation3 + $0x1] sm:$0x1] %v108_v12  ;;  %v135_v14 = vadd.f32 %v132_v11, %v118_v13 }
  0xcb   :  { %v265_v15 = vpop.f32.mrf.mxu0  ;;  %v271_v16 = vpop.f32.mrf.mxu1 }
  0xcc   :  { %v137_v17 = vmax.f32 %v135_v14, 0.0 }
  0xcd   :  { %v113_v19 = vpop.f32.mrf.mxu0 }
  0xce   :  { %v134_v20 = vadd.f32 %v127_v18, %v113_v19  ;;  %273 = vmatpush3.msk.msra.mxu1 %vm153_vm3, %v137_v17 }
  0xcf   :  { %v268_v21 = vpop.f32.mrf.mxu0  ;;  %274 = vmatprep.subr.mxu1 %v311_v2 }
  0xd0   :  { %v136_v22 = vmax.f32 %v134_v20, 0.0 }
  0xd2   :  { %275 = vmatpush3.msra.mxu1 %v136_v22 }
  0xd3   :  { %277 = vmatmul.mubr.msk.f32.vlgmr.msra.gmra.mxu1 %vm149_vm4, %v138_v23 }
 0x193   :  { %v223_v29 = vpop.f32.mrf.mxu1 }
 0x194   :  { %v224_v30 = vadd.f32 %v223_v29, %v148_v28 }
 0x195   :  { %v278_v31 = vpop.f32.mrf.mxu1 }
 0x196   :  { %v227_v32 = vadd.f32 %v224_v30, %v108_v12  ;;  %230 = vst [vmem:[#allocation3 + $0x2] sm:$0x1] %v224_v30 }
 0x198   :  { %228 = vst [vmem:[#allocation3] sm:$0x1] %v227_v32 }
 0x199   :  { %300 = shalt.err (!%p297_p4)
}
 0x19a   :  { %240 = dma.vmem_to_hbm [thread:$0]  %s238_s8, 64, %s383_s5, [#allocation4]  }
 0x19b   :  { %309 = dma.done.wait [#allocation4], 64  }
 0x19c   :  { %310 = vsyncadd [#allocation4], 4294967232 }
 0x19d   :  { %244 = vsyncpa [#allocation4], 1 }

</bundles_post_ra>
